<compile_context>
chip_gen: v7x
topology: tpu7x:2x2x1
jax: 0.10.0
libtpu: 0.0.40
codegen_flags: <defaults>
</compile_context>

<pallas_src>
import functools

import jax
import jax.numpy as jnp
from jax import lax
from jax.experimental import pallas as pl
from jax.experimental.pallas import tpu as pltpu


# ----------------------------------------------------------------------------
# Pallas kernels  (working layout: logits/gumbel/weights are (F, P))
# ----------------------------------------------------------------------------
def _hacnet_train_kernel(inv_t_ref, x_ref, logits_ref, gumbel_ref,
                         out_ref, w_ref):
    """Training-mode forward: relaxed-one-hot (Gumbel-softmax) + matmul."""
    inv_t = inv_t_ref[0, 0]                       # runtime scalar from SMEM
    z = (logits_ref[...] + gumbel_ref[...]) * inv_t          # (F, P) f32
    # numerically-stable softmax over the feature (sublane) axis
    z = z - jnp.max(z, axis=0, keepdims=True)
    e = jnp.exp(z)
    d = jnp.sum(e, axis=0, keepdims=True)                    # (1, P)
    # EUP approximate reciprocal + one Newton refinement: rel. error ~eps^2,
    # comfortably inside the 1e-5 weights tolerance, and keeps the VALU free.
    r = pl.reciprocal(d, approx=True)
    r = r * (2.0 - d * r)
    w = e * r                                                # (F, P)
    w_ref[...] = w                                           # lane-dense store
    # einsum('bpf,bf->bp') == x (B,F) @ w (F,P): natural MXU orientation,
    # lane-dense (B, P) output.
    out_ref[...] = lax.dot_general(
        x_ref[...], w,
        dimension_numbers=(((1,), (0,)), ((), ())),
        preferred_element_type=jnp.float32)


def _hacnet_eval_kernel(x_ref, logits_ref, out_ref, w_ref):
    """Eval-mode forward: hard one-hot of per-pixel argmax over features."""
    logits = logits_ref[...]                                 # (F, P) f32
    n_feat = logits.shape[0]
    mx = jnp.max(logits, axis=0, keepdims=True)              # (1, P)
    sub_idx = lax.broadcasted_iota(jnp.int32, logits.shape, 0)
    # first-max tie breaking, identical to jnp.argmax / torch.argmax
    first = jnp.min(jnp.where(logits == mx, sub_idx, n_feat),
                    axis=0, keepdims=True)                   # (1, P)
    w = (sub_idx == first).astype(jnp.float32)               # (F, P) one-hot
    w_ref[...] = w
    out_ref[...] = lax.dot_general(
        x_ref[...], w,
        dimension_numbers=(((1,), (0,)), ((), ())),
        preferred_element_type=jnp.float32)


# ----------------------------------------------------------------------------
# Wrapper (single jit: layout plumbing fuses around the pallas_call)
# ----------------------------------------------------------------------------
@functools.partial(jax.jit, static_argnames=("training",))
def hacnet_forward(x, log_alpha, gumbel_noise, temperature, training=True):
    """x: (B, F); log_alpha: (1, P, F); gumbel_noise: (1, P, F).

    `temperature` is a runtime scalar (no recompilation when it anneals).
    Returns (out (B, P) f32, weights (1, P, F) f32), matching
    HACNet.forward(x) in PyTorch.
    """
    B, F = x.shape
    _, P, F2 = log_alpha.shape
    assert F == F2

    # (F, P) working layout: pixels on lanes, features on sublanes.
    logits_fp = jnp.transpose(log_alpha.reshape(P, F)).astype(jnp.float32)
    x_f32 = x.astype(jnp.float32)

    out_shapes = (
        jax.ShapeDtypeStruct((B, P), jnp.float32),   # einsum result
        jax.ShapeDtypeStruct((F, P), jnp.float32),   # attention weights (F,P)
    )
    out_specs = (
        pl.BlockSpec((B, P), lambda: (0, 0)),
        pl.BlockSpec((F, P), lambda: (0, 0)),
    )

    if training:
        gumbel_fp = jnp.transpose(gumbel_noise.reshape(P, F)).astype(jnp.float32)
        # Runtime scalar (1/temperature) in SMEM -> no recompiles as it anneals.
        inv_t = (1.0 / jnp.asarray(temperature, dtype=jnp.float32)).reshape(1, 1)
        in_specs = [
            pl.BlockSpec(memory_space=pltpu.MemorySpace.SMEM),  # 1/temperature
            pl.BlockSpec((B, F), lambda: (0, 0)),               # x
            pl.BlockSpec((F, P), lambda: (0, 0)),               # log_alpha.T
            pl.BlockSpec((F, P), lambda: (0, 0)),               # gumbel.T
        ]
        kernel = _hacnet_train_kernel
        args = (inv_t, x_f32, logits_fp, gumbel_fp)
        cost = pl.CostEstimate(
            flops=2 * B * P * F + 6 * P * F,
            transcendentals=P * F + P,
            bytes_accessed=4 * (2 * P * F + B * F + P * F + B * P))
    else:
        kernel = _hacnet_eval_kernel
        in_specs = [
            pl.BlockSpec((B, F), lambda: (0, 0)),    # x
            pl.BlockSpec((F, P), lambda: (0, 0)),    # log_alpha.T
        ]
        args = (x_f32, logits_fp)
        cost = pl.CostEstimate(
            flops=2 * B * P * F + 5 * P * F,
            transcendentals=0,
            bytes_accessed=4 * (P * F + B * F + P * F + B * P))

    out, weights_fp = pl.pallas_call(
        kernel,
        out_shape=out_shapes,
        grid=(),                      # whole problem fits in one VMEM tile
        in_specs=in_specs,
        out_specs=out_specs,
        cost_estimate=cost,
    )(*args)

    # Undo the working layout: (F, P) -> module's (1, P, F).  Fused in the jit.
    weights = jnp.transpose(weights_fp).reshape(1, P, F)
    return out, weights


# ----------------------------------------------------------------------------
# Pure-JAX reference (for correctness check)
# ----------------------------------------------------------------------------
def hacnet_reference(x, log_alpha, gumbel_noise, temperature, training=True):
    if training:
        z = (log_alpha + gumbel_noise) / temperature
        weights = jax.nn.softmax(z, axis=-1)
    else:
        weights = jax.nn.one_hot(jnp.argmax(log_alpha, axis=2),
                                 log_alpha.shape[-1], dtype=jnp.float32)
    out = jnp.einsum('bpf,bf->bp', weights, x)
    return out, weights


# ----------------------------------------------------------------------------
# Main
# ----------------------------------------------------------------------------
if __name__ == "__main__":
    # Hyperparameters (small shapes, consistent with the module)
    hparam = {
        "max_iteration": 100,
        "t_start": 1.0,
        "t_end": 0.1,
        "image_scale": 16,     # n_pixel = 256
        "reg_coef": 1e-3,
    }
    in_dim = 32                # F
    batch = 2                  # B
    n_pixel = hparam["image_scale"] * hparam["image_scale"]   # P = 256
    ite = 0
    temperature = hparam["t_start"] * (
        hparam["t_end"] / hparam["t_start"]) ** (ite / hparam["max_iteration"])

    key = jax.random.PRNGKey(0)
    k_alpha, k_x, k_gumbel = jax.random.split(key, 3)

    # xavier_normal_ on a (1, P, F) tensor: fan_in = P*F, fan_out = 1*F
    fan_in = n_pixel * in_dim
    fan_out = 1 * in_dim
    xavier_std = (2.0 / (fan_in + fan_out)) ** 0.5
    log_alpha = xavier_std * jax.random.normal(
        k_alpha, (1, n_pixel, in_dim), dtype=jnp.float32)

    x = jax.random.normal(k_x, (batch, in_dim), dtype=jnp.float32)

    # Deterministic Gumbel noise for the RelaxedOneHotCategorical rsample
    # (reparameterization: softmax((logits + G)/T), G ~ Gumbel(0,1)).
    u = jax.random.uniform(k_gumbel, (1, n_pixel, in_dim),
                           dtype=jnp.float32, minval=1e-6, maxval=1.0 - 1e-6)
    gumbel_noise = -jnp.log(-jnp.log(u))

    # Training-mode forward
    out_tr, w_tr = hacnet_forward(x, log_alpha, gumbel_noise,
                                  jnp.float32(temperature), training=True)
    out_tr = jax.block_until_ready(out_tr)
    w_tr = jax.block_until_ready(w_tr)
    ref_out_tr, ref_w_tr = hacnet_reference(x, log_alpha, gumbel_noise,
                                            temperature, training=True)

    # A second training call with a different (annealed) temperature — same
    # compiled kernel / jit, new runtime scalar.
    ite2 = 50
    temperature2 = hparam["t_start"] * (
        hparam["t_end"] / hparam["t_start"]) ** (ite2 / hparam["max_iteration"])
    out_tr2, w_tr2 = hacnet_forward(x, log_alpha, gumbel_noise,
                                    jnp.float32(temperature2), training=True)
    out_tr2 = jax.block_until_ready(out_tr2)
    w_tr2 = jax.block_until_ready(w_tr2)
    ref_out_tr2, ref_w_tr2 = hacnet_reference(x, log_alpha, gumbel_noise,
                                              temperature2, training=True)

    # Eval-mode forward (one-hot argmax)
    out_ev, w_ev = hacnet_forward(x, log_alpha, gumbel_noise,
                                  jnp.float32(temperature), training=False)
    out_ev = jax.block_until_ready(out_ev)
    w_ev = jax.block_until_ready(w_ev)
    ref_out_ev, ref_w_ev = hacnet_reference(x, log_alpha, gumbel_noise,
                                            temperature, training=False)

    assert out_tr.shape == (batch, n_pixel)
    assert w_tr.shape == (1, n_pixel, in_dim)
    assert jnp.allclose(out_tr, ref_out_tr, atol=1e-4, rtol=1e-4)
    assert jnp.allclose(w_tr, ref_w_tr, atol=1e-5, rtol=1e-5)
    assert jnp.allclose(out_tr2, ref_out_tr2, atol=1e-4, rtol=1e-4)
    assert jnp.allclose(w_tr2, ref_w_tr2, atol=1e-5, rtol=1e-5)
    assert jnp.allclose(out_ev, ref_out_ev, atol=1e-4, rtol=1e-4)
    assert jnp.allclose(w_ev, ref_w_ev, atol=1e-5, rtol=1e-5)

    print("KERNEL_OK")
</pallas_src>

<mosaic_0001>
module attributes {stable_mosaic.version = 11 : i64} {
  func.func @_hacnet_train_kernel(%arg0: memref<1x1xf32, #tpu.memory_space<smem>>, %arg1: memref<2x32xf32, #tpu.memory_space<vmem>>, %arg2: memref<32x256xf32, #tpu.memory_space<vmem>>, %arg3: memref<32x256xf32, #tpu.memory_space<vmem>>, %arg4: memref<2x256xf32, #tpu.memory_space<vmem>>, %arg5: memref<32x256xf32, #tpu.memory_space<vmem>>) attributes {dimension_semantics = [], scalar_prefetch = 0 : i64, scratch_operands = 0 : i64, tpu.core_type = #tpu.core_type<tc>} {
    %c0 = arith.constant 0 : index
    %c0_0 = arith.constant 0 : index
    %0 = memref.load %arg0[%c0, %c0_0] : memref<1x1xf32, #tpu.memory_space<smem>>
    %c0_1 = arith.constant 0 : index
    %c0_2 = arith.constant 0 : index
    %1 = vector.load %arg2[%c0_1, %c0_2] : memref<32x256xf32, #tpu.memory_space<vmem>>, vector<32x256xf32>
    %c0_3 = arith.constant 0 : index
    %c0_4 = arith.constant 0 : index
    %2 = vector.load %arg3[%c0_3, %c0_4] : memref<32x256xf32, #tpu.memory_space<vmem>>, vector<32x256xf32>
    %3 = arith.addf %1, %2 : vector<32x256xf32>
    %4 = vector.broadcast %0 : f32 to vector<32x256xf32>
    %5 = arith.mulf %3, %4 : vector<32x256xf32>
    %cst = arith.constant dense<0xFF800000> : vector<256xf32>
    %6 = vector.multi_reduction <maximumf>, %5, %cst [0] : vector<32x256xf32> to vector<256xf32>
    %7 = vector.shape_cast %6 : vector<256xf32> to vector<1x256xf32>
    %8 = vector.broadcast %7 : vector<1x256xf32> to vector<32x256xf32>
    %9 = arith.subf %5, %8 : vector<32x256xf32>
    %10 = math.exp %9 : vector<32x256xf32>
    %cst_5 = arith.constant dense<0.000000e+00> : vector<256xf32>
    %11 = vector.multi_reduction <add>, %10, %cst_5 [0] : vector<32x256xf32> to vector<256xf32>
    %12 = vector.shape_cast %11 : vector<256xf32> to vector<1x256xf32>
    %13 = tpu.reciprocal %12 {approx = true} : vector<1x256xf32> -> vector<1x256xf32>
    %14 = arith.mulf %12, %13 : vector<1x256xf32>
    %cst_6 = arith.constant 2.000000e+00 : f32
    %15 = vector.broadcast %cst_6 : f32 to vector<1x256xf32>
    %16 = arith.subf %15, %14 : vector<1x256xf32>
    %17 = arith.mulf %13, %16 : vector<1x256xf32>
    %18 = vector.broadcast %17 : vector<1x256xf32> to vector<32x256xf32>
    %19 = arith.mulf %10, %18 : vector<32x256xf32>
    %c0_7 = arith.constant 0 : index
    %c0_8 = arith.constant 0 : index
    %20 = vector.load %arg5[%c0_7, %c0_8] : memref<32x256xf32, #tpu.memory_space<vmem>>, vector<32x256xf32>
    tpu.vector_store %arg5[%c0_7, %c0_8], %19 {strides = array<i32>} : memref<32x256xf32, #tpu.memory_space<vmem>>, vector<32x256xf32>,
    %c0_9 = arith.constant 0 : index
    %c0_10 = arith.constant 0 : index
    %21 = vector.load %arg1[%c0_9, %c0_10] : memref<2x32xf32, #tpu.memory_space<vmem>>, vector<2x32xf32>
    %cst_11 = arith.constant dense<0.000000e+00> : vector<2x256xf32>
    %22 = tpu.matmul %21, %19, %cst_11 {dimension_numbers = #tpu.dot_dimension_numbers<[1], [0], [0], [1], [0, 0, 1, 1], [], []>} : vector<2x32xf32>, vector<32x256xf32>, vector<2x256xf32> -> vector<2x256xf32>
    %c0_12 = arith.constant 0 : index
    %c0_13 = arith.constant 0 : index
    %23 = vector.load %arg4[%c0_12, %c0_13] : memref<2x256xf32, #tpu.memory_space<vmem>>, vector<2x256xf32>
    tpu.vector_store %arg4[%c0_12, %c0_13], %22 {strides = array<i32>} : memref<2x256xf32, #tpu.memory_space<vmem>>, vector<2x256xf32>,
    return
  }
}

</mosaic_0001>

<bundles_post_ra>
// kernel: hacnet_forward.1
= control target key start
LH: loop header
LB: loop body
LE: loop exit
PB: predicated region body
PF: predicated region fallthrough
CT: control target
= control target key end

     0   :  { %12 = vsyncpa [#allocation4], 0  ;;  %s521_s0 = inlined_call_operand.<no memory space> [shape: f32[1,1], index: 0, kind: input, shape index: {}]   ;;  %s522_s1 = inlined_call_operand.vmem [shape: f32[2,32], index: 1, kind: input, shape index: {}]   ;;  %s523_s2 = inlined_call_operand.hbm [shape: f32[32,256], index: 2, kind: input, shape index: {}]   ;;  %s524_s3 = inlined_call_operand.hbm [shape: f32[32,256], index: 3, kind: input, shape index: {}]   ;;  %s525_s4 = inlined_call_operand.hbm [shape: f32[2,256], index: 4, kind: output, shape index: {0}]   ;;  %s526_s5 = inlined_call_operand.hbm [shape: f32[32,256], index: 5, kind: output, shape index: {1}]  }
   0x1   :  { %13 = vsyncpa [#allocation7], 0 }
   0x2   :  { %14 = vsyncpa [#allocation5], 0 }
   0x3   :  { %15 = vsyncpa [#allocation10], 0  ;;  %s421_s18 = smov [#allocation3]   ;;  %s325_s22 = scalar_lea.hbm %s523_s2, 1024 }
   0x4   :  { %s25_s19 = sshll.u32 %s421_s18, 4  ;;  %p326_p0 = scmp.ne.s32.totalorder %s523_s2, %s325_s22  ;;  %s26_s19 = int_to_ptr.vmem [resolvable:$true] %s25_s19 }
   0x5   :  { %p329_p1 = scmp.lt.u32.totalorder %s325_s22, %s523_s2 }
   0x7   :  { %p331_p2 = pnand %p329_p1, %p326_p0 }
   0x9   :  { %334 = shalt.err (!%p331_p2)
}
   0xa   :  { %s335_s27 = scalar_lea.vmem %s26_s19, 1024  ;;  %p340_p4 = scmp.lt.s32.totalorder %s26_s19, %s26_s19 }
   0xb   :  { %p336_p3 = scmp.ne.s32.totalorder %s26_s19, %s335_s27  ;;  %p341_p5 = scmp.lt.s32.totalorder %s335_s27, %s335_s27 }
   0xd   :  { %p342_p6 = por %p341_p5, %p340_p4 }
   0xf   :  { %p343_p7 = pnand %p342_p6, %p336_p3 }
  0x11   :  { %346 = shalt.err (!%p343_p7)
}
  0x12   :  { %s422_s28 = smov 256   ;;  %s423_s29 = smov 16  }
  0x13   :  { %31 = dma.hbm_to_vmem [thread:$0]  %s523_s2, 1024, %s26_s19, [#allocation4], %s422_s28, %s422_s28, %s423_s29  }
  0x14   :  { %s424_s7 = smov [#allocation6]   ;;  %s347_s11 = scalar_lea.hbm %s524_s3, 1024 }
  0x15   :  { %s37_s8 = sshll.u32 %s424_s7, 4  ;;  %p348_p8 = scmp.ne.s32.totalorder %s524_s3, %s347_s11  ;;  %s38_s8 = int_to_ptr.vmem [resolvable:$true] %s37_s8 }
  0x16   :  { %p351_p9 = scmp.lt.u32.totalorder %s347_s11, %s524_s3 }
  0x18   :  { %p353_p10 = pnand %p351_p9, %p348_p8 }
  0x1a   :  { %356 = shalt.err (!%p353_p10)
}
  0x1b   :  { %s357_s16 = scalar_lea.vmem %s38_s8, 1024  ;;  %p362_p12 = scmp.lt.s32.totalorder %s38_s8, %s38_s8 }
  0x1c   :  { %p358_p11 = scmp.ne.s32.totalorder %s38_s8, %s357_s16  ;;  %p363_p13 = scmp.lt.s32.totalorder %s357_s16, %s357_s16 }
  0x1e   :  { %p364_p0 = por %p363_p13, %p362_p12 }
  0x20   :  { %p365_p1 = pnand %p364_p0, %p358_p11 }
  0x22   :  { %368 = shalt.err (!%p365_p1)
}
  0x23   :  { %43 = dma.hbm_to_vmem [thread:$0]  %s524_s3, 1024, %s38_s8, [#allocation7], %s422_s28, %s422_s28, %s423_s29  }
  0x24   :  { %413 = dma.done.wait [#allocation4], 1024  }
  0x25   :  { %414 = vsyncadd [#allocation4], 4294966272 }
  0x26   :  { %415 = dma.done.wait [#allocation7], 1024  }
  0x27   :  { %416 = vsyncadd [#allocation7], 4294966272  ;;  %v425_v0 = vmov 0.0   ;;  %v52_v1 = vld [vmem:[#allocation3 + $0x8] sm:$0xff]  ;;  %v54_v2 = vld [vmem:[#allocation3 + $0x18] sm:$0xff]  ;;  %v75_v7 = vstv %s521_s0  ;;  %vm169_vm0 = vcmask 261120  }
  0x28   :  { %237 = vmatprep.mubr.f32.mxu0 %v425_v0  ;;  %v56_v3 = vld [vmem:[#allocation3 + $0x28] sm:$0xff]  ;;  %v58_v4 = vld [vmem:[#allocation3 + $0x38] sm:$0xff]  ;;  %v51_v12 = vld [vmem:[#allocation3] sm:$0xff]  ;;  %s426_s20 = smov [#allocation9]  }
  0x29   :  { %v60_v5 = vld [vmem:[#allocation6 + $0x8] sm:$0xff]  ;;  %v62_v6 = vld [vmem:[#allocation6 + $0x18] sm:$0xff]  ;;  %v53_v15 = vld [vmem:[#allocation3 + $0x10] sm:$0xff]  ;;  %s271_s21 = sshll.u32 %s426_s20, 4  ;;  %s272_s21 = int_to_ptr.vmem [resolvable:$true] %s271_s21 }
  0x2a   :  { %v64_v8 = vld [vmem:[#allocation6 + $0x28] sm:$0xff]  ;;  %v66_v9 = vld [vmem:[#allocation6 + $0x38] sm:$0xff]  ;;  %v68_v10 = vadd.f32 %v60_v5, %v52_v1  ;;  %v70_v11 = vadd.f32 %v62_v6, %v54_v2  ;;  %v55_v16 = vld [vmem:[#allocation3 + $0x20] sm:$0xff]  ;;  %s369_s22 = scalar_lea.vmem %s272_s21, 1024  ;;  %p374_p3 = scmp.lt.s32.totalorder %s272_s21, %s272_s21 }
  0x2b   :  { %v72_v13 = vadd.f32 %v64_v8, %v56_v3  ;;  %v74_v14 = vadd.f32 %v66_v9, %v58_v4  ;;  %v57_v17 = vld [vmem:[#allocation3 + $0x30] sm:$0xff]  ;;  %v59_v20 = vld [vmem:[#allocation6] sm:$0xff]  ;;  %p370_p2 = scmp.ne.s32.totalorder %s272_s21, %s369_s22  ;;  %p375_p4 = scmp.lt.s32.totalorder %s369_s22, %s369_s22 }
  0x2c   :  { %v77_v18 = vmul.f32 %v75_v7, %v68_v10  ;;  %v79_v19 = vmul.f32 %v75_v7, %v70_v11  ;;  %v61_v21 = vld [vmem:[#allocation6 + $0x10] sm:$0xff]  ;;  %v63_v22 = vld [vmem:[#allocation6 + $0x20] sm:$0xff]  ;;  %v67_v26 = vadd.f32 %v59_v20, %v51_v12 }
  0x2d   :  { %v81_v23 = vmul.f32 %v75_v7, %v72_v13  ;;  %v83_v24 = vmul.f32 %v75_v7, %v74_v14  ;;  %v65_v25 = vld [vmem:[#allocation6 + $0x30] sm:$0xff]  ;;  %v69_v27 = vadd.f32 %v61_v21, %v53_v15  ;;  %v71_v28 = vadd.f32 %v63_v22, %v55_v16  ;;  %p376_p5 = por %p375_p4, %p374_p3 }
  0x2e   :  { %v73_v29 = vadd.f32 %v65_v25, %v57_v17  ;;  %v76_v32 = vmul.f32 %v75_v7, %v67_v26 }
  0x2f   :  { %v93_v30 = vmax.f32 %v77_v18, %v81_v23  ;;  %v94_v31 = vmax.f32 %v79_v19, %v83_v24  ;;  %v78_v33 = vmul.f32 %v75_v7, %v69_v27  ;;  %v80_v34 = vmul.f32 %v75_v7, %v71_v28  ;;  %p377_p6 = pnand %p376_p5, %p370_p2 }
  0x30   :  { %v82_v35 = vmul.f32 %v75_v7, %v73_v29 }
  0x31   :  { %v95_v36 = vmax.f32 %v93_v30, %v94_v31  ;;  %v84_v37 = vmax.f32 %v76_v32, %v80_v34 }
  0x32   :  { %v85_v38 = vmax.f32 %v78_v33, %v82_v35 }
  0x33   :  { %v96_v39 = vrot.slane %v95_v36, 4 }
  0x34   :  { %v86_v40 = vmax.f32 %v84_v37, %v85_v38 }
  0x35   :  { %v97_v41 = vmax.f32 %v95_v36, %v96_v39 }
  0x36   :  { %v87_v42 = vrot.slane %v86_v40, 4 }
  0x37   :  { %v98_v43 = vrot.slane %v97_v41, 2 }
  0x38   :  { %v88_v44 = vmax.f32 %v86_v40, %v87_v42 }
  0x39   :  { %v99_v45 = vmax.f32 %v97_v41, %v98_v43 }
  0x3a   :  { %v89_v46 = vrot.slane %v88_v44, 2 }
  0x3b   :  { %v100_v47 = vrot.slane %v99_v45, 1 }
  0x3c   :  { %v90_v48 = vmax.f32 %v88_v44, %v89_v46 }
  0x3d   :  { %v101_v49 = vmax.f32 %v99_v45, %v100_v47 }
  0x3e   :  { %v91_v50 = vrot.slane %v90_v48, 1 }
  0x3f   :  { %v103_v51 = vsub.f32 %v77_v18, %v101_v49  ;;  %v105_v52 = vsub.f32 %v79_v19, %v101_v49  ;;  %v107_v53 = vsub.f32 %v81_v23, %v101_v49  ;;  %v109_v54 = vsub.f32 %v83_v24, %v101_v49 }
  0x40   :  { %v92_v55 = vmax.f32 %v90_v48, %v91_v50  ;;  %v168_v50 = vld [vmem:[%s522_s1] sm:$0x3] }
  0x41   :  { %v112_v56 = vmul.f32 1.442695, %v103_v51  ;;  %v116_v57 = vmul.f32 1.442695, %v105_v52  ;;  %v120_v58 = vmul.f32 1.442695, %v107_v53 }
  0x42   :  { %v124_v59 = vmul.f32 1.442695, %v109_v54  ;;  %v102_v60 = vsub.f32 %v76_v32, %v92_v55  ;;  %v104_v61 = vsub.f32 %v78_v33, %v92_v55  ;;  %v106_v62 = vsub.f32 %v80_v34, %v92_v55 }
  0x43   :  { %305 = vpow2.f32 %v112_v56  ;;  %v108_v63 = vsub.f32 %v82_v35, %v92_v55 }
  0x44   :  { %307 = vpow2.f32 %v116_v57  ;;  %v110_v0 = vmul.f32 1.442695, %v102_v60  ;;  %v114_v1 = vmul.f32 1.442695, %v104_v61  ;;  %v118_v2 = vmul.f32 1.442695, %v106_v62 }
  0x45   :  { %309 = vpow2.f32 %v120_v58  ;;  %v122_v3 = vmul.f32 1.442695, %v108_v63 }
  0x46   :  { %311 = vpow2.f32 %v124_v59 }
  0x47   :  { %313 = vpow2.f32 %v110_v0 }
  0x48   :  { %315 = vpow2.f32 %v114_v1 }
  0x49   :  { %317 = vpow2.f32 %v118_v2 }
  0x4a   :  { %319 = vpow2.f32 %v122_v3 }
  0x4d   :  { %v306_v4 = vpop.eup %305 }
  0x4e   :  { %v308_v5 = vpop.eup %307 }
  0x4f   :  { %v310_v6 = vpop.eup %309  ;;  %v135_v7 = vadd.f32 %v308_v5, %v306_v4 }
  0x50   :  { %v312_v8 = vpop.eup %311 }
  0x51   :  { %v314_v9 = vpop.eup %313  ;;  %v136_v10 = vadd.f32 %v310_v6, %v135_v7 }
  0x52   :  { %v316_v11 = vpop.eup %315 }
  0x53   :  { %v318_v12 = vpop.eup %317  ;;  %v137_v13 = vadd.f32 %v312_v8, %v136_v10  ;;  %v126_v14 = vadd.f32 %v316_v11, %v314_v9 }
  0x54   :  { %v320_v15 = vpop.eup %319 }
  0x55   :  { %v138_v16 = vrot.slane %v137_v13, 4  ;;  %v127_v17 = vadd.f32 %v318_v12, %v126_v14 }
  0x57   :  { %v139_v18 = vadd.f32 %v138_v16, %v137_v13  ;;  %v128_v19 = vadd.f32 %v320_v15, %v127_v17 }
  0x59   :  { %v140_v20 = vrot.slane %v139_v18, 2  ;;  %v129_v21 = vrot.slane %v128_v19, 4 }
  0x5b   :  { %v141_v22 = vadd.f32 %v140_v20, %v139_v18  ;;  %v130_v23 = vadd.f32 %v129_v21, %v128_v19 }
  0x5d   :  { %v142_v24 = vrot.slane %v141_v22, 1  ;;  %v131_v25 = vrot.slane %v130_v23, 2 }
  0x5f   :  { %v143_v26 = vadd.f32 %v142_v24, %v141_v22  ;;  %v132_v27 = vadd.f32 %v131_v25, %v130_v23 }
  0x61   :  { %321 = vrcp.f32 %v143_v26  ;;  %v133_v28 = vrot.slane %v132_v27, 1 }
  0x63   :  { %v134_v29 = vadd.f32 %v133_v28, %v132_v27 }
  0x65   :  { %323 = vrcp.f32 %v134_v29 }
  0x6b   :  { %v322_v30 = vpop.eup %321 }
  0x6c   :  { %v147_v31 = vmul.f32 %v322_v30, %v143_v26 }
  0x6e   :  { %v149_v32 = vsub.f32 2.0, %v147_v31 }
  0x6f   :  { %v324_v33 = vpop.eup %323 }
  0x70   :  { %v151_v34 = vmul.f32 %v322_v30, %v149_v32  ;;  %v146_v35 = vmul.f32 %v324_v33, %v134_v29 }
  0x72   :  { %v153_v36 = vmul.f32 %v306_v4, %v151_v34  ;;  %v155_v37 = vmul.f32 %v308_v5, %v151_v34  ;;  %v148_v38 = vsub.f32 2.0, %v146_v35  ;;  %v157_v39 = vmul.f32 %v310_v6, %v151_v34 }
  0x73   :  { %v159_v40 = vmul.f32 %v312_v8, %v151_v34 }
  0x74   :  { %161 = vst [vmem:[#allocation9 + $0x8] sm:$0xff] %v153_v36  ;;  %163 = vst [vmem:[#allocation9 + $0x18] sm:$0xff] %v155_v37  ;;  %v290_v41 = vpack.c.bf16 %v155_v37, %v153_v36  ;;  %v150_v42 = vmul.f32 %v324_v33, %v148_v38 }
  0x75   :  { %165 = vst [vmem:[#allocation9 + $0x28] sm:$0xff] %v157_v39  ;;  %167 = vst [vmem:[#allocation9 + $0x38] sm:$0xff] %v159_v40  ;;  %v294_v47 = vpack.c.bf16 %v159_v40, %v157_v39 }
  0x76   :  { %291 = vmatprep.subr.bf16.mxu0 %v290_v41  ;;  %v152_v43 = vmul.f32 %v314_v9, %v150_v42  ;;  %v154_v44 = vmul.f32 %v316_v11, %v150_v42  ;;  %v156_v45 = vmul.f32 %v318_v12, %v150_v42  ;;  %v158_v46 = vmul.f32 %v320_v15, %v150_v42 }
  0x78   :  { %160 = vst [vmem:[#allocation9] sm:$0xff] %v152_v43  ;;  %162 = vst [vmem:[#allocation9 + $0x10] sm:$0xff] %v154_v44  ;;  %v292_v48 = vpack.c.bf16 %v154_v44, %v152_v43  ;;  %v296_v49 = vpack.c.bf16 %v158_v46, %v156_v45 }
  0x79   :  { %164 = vst [vmem:[#allocation9 + $0x20] sm:$0xff] %v156_v45  ;;  %166 = vst [vmem:[#allocation9 + $0x30] sm:$0xff] %v158_v46 }
  0x7a   :  { %293 = vmatpush1.bf16.msra.mxu0 %v292_v48 }
  0x7b   :  { %295 = vmatprep.subr.bf16.mxu0 %v294_v47 }
  0x7e   :  { %297 = vmatpush1.bf16.msra.mxu0 %v296_v49 }
  0x81   :  { %288 = vmatmul.mubr.msk.f32.vlgmr.msra.gmra.mrb[0].mxu0 %vm169_vm0, %v168_v50 }
  0x82   :  { %380 = shalt.err (!%p377_p6)
}
  0x83   :  { %s381_s25 = scalar_lea.hbm %s526_s5, 1024 }
  0x84   :  { %p382_p7 = scmp.ne.s32.totalorder %s526_s5, %s381_s25  ;;  %p385_p8 = scmp.lt.u32.totalorder %s381_s25, %s526_s5 }
  0x86   :  { %p387_p9 = pnand %p385_p8, %p382_p7 }
  0x88   :  { %390 = shalt.err (!%p387_p9)
}
  0x89   :  { %277 = dma.vmem_to_hbm [thread:$0]  %s272_s21, 1024, %s526_s5, [#allocation10], %s422_s28, %s422_s28, %s423_s29  }
  0x8a   :  { %s427_s8 = smov [#allocation8]  }
  0x8b   :  { %s262_s9 = sshll.u32 %s427_s8, 4  ;;  %s263_s9 = int_to_ptr.vmem [resolvable:$true] %s262_s9 }
  0x8c   :  { %s391_s10 = scalar_lea.vmem %s263_s9, 64  ;;  %p396_p11 = scmp.lt.s32.totalorder %s263_s9, %s263_s9 }
  0x8d   :  { %p392_p10 = scmp.ne.s32.totalorder %s263_s9, %s391_s10  ;;  %p397_p12 = scmp.lt.s32.totalorder %s391_s10, %s391_s10 }
  0x8f   :  { %p398_p13 = por %p397_p12, %p396_p11 }
  0x91   :  { %p399_p0 = pnand %p398_p13, %p392_p10 }
 0x154   :  { %v239_v51 = vpop.f32.mrb[0].mxu0 }
 0x155   :  { %v241_v52 = vpop.f32.mrb[1].mxu0 }
 0x156   :  { %v246_v53 = vcombine.low %v239_v51, %v241_v52 }
 0x158   :  { %289 = vst.sshfl [vmem:[#allocation8] sm:$0x33 pattern:$0x76325410] %v246_v53 }
 0x159   :  { %402 = shalt.err (!%p399_p0)
}
 0x15a   :  { %s403_s13 = scalar_lea.hbm %s525_s4, 64 }
 0x15b   :  { %p404_p1 = scmp.ne.s32.totalorder %s525_s4, %s403_s13  ;;  %p407_p2 = scmp.lt.u32.totalorder %s403_s13, %s525_s4 }
 0x15d   :  { %p409_p3 = pnand %p407_p2, %p404_p1 }
 0x15f   :  { %412 = shalt.err (!%p409_p3)
}
 0x160   :  { %265 = dma.vmem_to_hbm [thread:$0]  %s263_s9, 64, %s525_s4, [#allocation5]  }
 0x161   :  { %417 = dma.done.wait [#allocation5], 64  }
 0x162   :  { %418 = vsyncadd [#allocation5], 4294967232 }
 0x163   :  { %419 = dma.done.wait [#allocation10], 1024  }
 0x164   :  { %420 = vsyncadd [#allocation10], 4294966272 }
 0x165   :  { %284 = vsyncpa [#allocation4], 1 }
 0x166   :  { %285 = vsyncpa [#allocation7], 1 }
 0x167   :  { %286 = vsyncpa [#allocation5], 1 }
 0x168   :  { %287 = vsyncpa [#allocation10], 1 }

</bundles_post_ra>
